<compile_context>
chip_gen: v6e
topology: v6e:2x2x1
jax: 0.10.0
libtpu: 0.0.40
codegen_flags: <defaults>
</compile_context>

<pallas_src>
import functools

import jax
import jax.numpy as jnp
from jax.experimental import pallas as pl
from jax.experimental.pallas import tpu as pltpu


def _round_up(a, b):
    return (a + b - 1) // b * b


def _ff_kernel(x_ref, g_ref, b_ref, w1_ref, b1_ref, w2_ref, b2_ref, o_ref,
               xn_ref, acc_ref, *, eps):
    """One (tm, C) row tile; grid axis 1 streams the hidden dim H in chunks of th."""
    k = pl.program_id(1)
    nk = pl.num_programs(1)

    # --- LayerNorm (f32) once per row tile, cached in VMEM scratch; zero the accumulator.
    @pl.when(k == 0)
    def _():
        x = x_ref[...].astype(jnp.float32)
        mean = jnp.mean(x, axis=-1, keepdims=True)
        var = jnp.mean((x - mean) * (x - mean), axis=-1, keepdims=True)
        xn = (x - mean) * jax.lax.rsqrt(var + eps)
        xn = xn * g_ref[...].astype(jnp.float32) + b_ref[...].astype(jnp.float32)
        xn_ref[...] = xn
        acc_ref[...] = jnp.zeros_like(acc_ref)

    # --- Linear(dim -> th chunk of hidden): MXU in the weights' native dtype, f32 acc.
    xn = xn_ref[...].astype(w1_ref.dtype)
    h = jnp.dot(xn, w1_ref[...], preferred_element_type=jnp.float32)
    h = h + b1_ref[...].astype(jnp.float32)

    # --- exact (erf) GELU in f32, matching nn.GELU() default.
    h = 0.5 * h * (1.0 + jax.lax.erf(h * 0.7071067811865476))

    # --- Linear(th chunk -> dim), accumulated in f32 scratch.
    acc_ref[...] += jnp.dot(h.astype(w2_ref.dtype), w2_ref[...],
                            preferred_element_type=jnp.float32)

    # --- finalize: add output bias and store once per row tile (lane-dense store).
    @pl.when(k == nk - 1)
    def _():
        y = acc_ref[...] + b2_ref[...].astype(jnp.float32)
        o_ref[...] = y.astype(y.dtype) if o_ref.dtype == jnp.float32 else y.astype(o_ref.dtype)
        o_ref[...] = y.astype(o_ref.dtype)


def _choose_tm(M, C, tm_req):
    """Row tile: multiple of 16 (covers bf16 sublane packing), shrunk for tiny M or huge C."""
    tm = _round_up(max(16, min(tm_req, _round_up(M, 16))), 16)
    # Keep the two f32 scratch tiles + double-buffered x/out tiles well under ~24 MiB.
    while tm > 16 and 6 * tm * C * 4 > 24 * 1024 * 1024:
        tm //= 2
        tm = _round_up(tm, 16)
    return tm


def _choose_th(C, H, itemsize, th_req, budget_bytes=16 * 1024 * 1024):
    """Hidden-dim tile: full weight residency when it fits a VMEM budget, else stream chunks."""
    if th_req is not None:
        if 0 < th_req <= H and H % th_req == 0 and (th_req == H or th_req % 128 == 0):
            return th_req
        return H
    if 2 * C * H * itemsize <= budget_bytes:
        return H  # W1 + W2 fully resident (constant index maps -> fetched once)
    th = H
    # Halve while the double-buffered (C,th)+(th,C) chunks still exceed the budget,
    # keeping th a 128-multiple divisor of H.
    while 4 * C * th * itemsize > budget_bytes and th % 256 == 0:
        th //= 2
    return th


def feedforward_pallas(x, gamma, beta, w1, b1, w2, b2, *, eps=1e-5, tm=256, th=None):
    """x: (B, N, C).  w1: (C, H), b1: (H,), w2: (H, C), b2: (C,).  Returns (B, N, C)."""
    B, N, C = x.shape
    H = w1.shape[1]
    M = B * N

    tm = _choose_tm(M, C, tm)
    M_pad = _round_up(M, tm)

    th = _choose_th(C, H, jnp.dtype(w1.dtype).itemsize, th)
    nk = H // th

    x2 = x.reshape(M, C)
    if M_pad != M:
        x2 = jnp.pad(x2, ((0, M_pad - M), (0, 0)))

    g2 = gamma.reshape(1, C)
    be2 = beta.reshape(1, C)
    b1_2 = b1.reshape(1, H)
    b2_2 = b2.reshape(1, C)

    itemsize_x = jnp.dtype(x.dtype).itemsize
    itemsize_w = jnp.dtype(w1.dtype).itemsize
    cost = pl.CostEstimate(
        flops=4 * M_pad * C * H,
        transcendentals=M_pad * H,
        bytes_accessed=(2 * M_pad * C * itemsize_x          # x in, y out
                        + 2 * C * H * itemsize_w            # W1 + W2
                        + (2 * C + H) * 4),                 # gamma/beta/b1/b2
    )

    grid = (M_pad // tm, nk)
    out = pl.pallas_call(
        functools.partial(_ff_kernel, eps=eps),
        out_shape=jax.ShapeDtypeStruct((M_pad, C), x.dtype),
        grid_spec=pltpu.PrefetchScalarGridSpec(
            num_scalar_prefetch=0,
            grid=grid,
            in_specs=[
                pl.BlockSpec((tm, C), lambda i, k: (i, 0)),   # x row tile (const over k)
                pl.BlockSpec((1, C), lambda i, k: (0, 0)),    # gamma
                pl.BlockSpec((1, C), lambda i, k: (0, 0)),    # beta
                pl.BlockSpec((C, th), lambda i, k: (0, k)),   # W1 chunk
                pl.BlockSpec((1, th), lambda i, k: (0, k)),   # b1 chunk
                pl.BlockSpec((th, C), lambda i, k: (k, 0)),   # W2 chunk
                pl.BlockSpec((1, C), lambda i, k: (0, 0)),    # b2
            ],
            out_specs=pl.BlockSpec((tm, C), lambda i, k: (i, 0)),
            scratch_shapes=[
                pltpu.VMEM((tm, C), jnp.float32),   # cached LayerNorm output
                pltpu.VMEM((tm, C), jnp.float32),   # f32 accumulator
            ],
        ),
        compiler_params=pltpu.CompilerParams(
            dimension_semantics=("parallel", "arbitrary"),
            vmem_limit_bytes=60 * 1024 * 1024,
        ),
        cost_estimate=cost,
    )(x2, g2, be2, w1, b1_2, w2, b2_2)

    return out[:M].reshape(B, N, C)


def feedforward_ref(x, gamma, beta, w1, b1, w2, b2, eps=1e-5):
    # Pure-JAX reference for correctness checking (f32 math).
    xf = x.astype(jnp.float32)
    mean = jnp.mean(xf, axis=-1, keepdims=True)
    var = jnp.mean((xf - mean) ** 2, axis=-1, keepdims=True)
    xn = (xf - mean) / jnp.sqrt(var + eps) * gamma.astype(jnp.float32) + beta.astype(jnp.float32)
    h = xn @ w1.astype(jnp.float32) + b1.astype(jnp.float32)
    h = 0.5 * h * (1.0 + jax.lax.erf(h / jnp.sqrt(2.0)))
    y = h @ w2.astype(jnp.float32) + b2.astype(jnp.float32)
    return y


if __name__ == "__main__":
    # Small shapes consistent with the module: input (B, N, C), hidden H.
    B, N, C, H = 2, 8, 32, 64
    key = jax.random.PRNGKey(0)
    kx, kg, kb, kw1, kb1, kw2, kb2 = jax.random.split(key, 7)

    x = jax.random.normal(kx, (B, N, C), dtype=jnp.float32)

    # Deterministic parameter init (LayerNorm affine + Linear weights/bias).
    gamma = 1.0 + 0.1 * jax.random.normal(kg, (C,), dtype=jnp.float32)
    beta = 0.1 * jax.random.normal(kb, (C,), dtype=jnp.float32)
    # Linear weights stored already-transposed: x @ W1 (C,H), h @ W2 (H,C).
    w1 = jax.random.normal(kw1, (C, H), dtype=jnp.float32) * (1.0 / jnp.sqrt(C))
    b1 = 0.05 * jax.random.normal(kb1, (H,), dtype=jnp.float32)
    w2 = jax.random.normal(kw2, (H, C), dtype=jnp.float32) * (1.0 / jnp.sqrt(H))
    b2 = 0.05 * jax.random.normal(kb2, (C,), dtype=jnp.float32)

    # --- f32 path (matches the PyTorch module's default dtype): tight tolerance.
    y = jax.block_until_ready(feedforward_pallas(x, gamma, beta, w1, b1, w2, b2))
    y_ref = feedforward_ref(x, gamma, beta, w1, b1, w2, b2).astype(x.dtype)
    assert y.shape == (B, N, C)
    assert jnp.allclose(y, y_ref, atol=1e-4, rtol=1e-4), "f32 mismatch vs reference"

    # --- bf16 weights/activations on the MXU (f32 accumulation): looser tolerance.
    xb = x.astype(jnp.bfloat16)
    w1b = w1.astype(jnp.bfloat16)
    w2b = w2.astype(jnp.bfloat16)
    yb = jax.block_until_ready(feedforward_pallas(xb, gamma, beta, w1b, b1, w2b, b2))
    yb_ref = feedforward_ref(xb, gamma, beta, w1b, b1, w2b, b2)
    assert yb.shape == (B, N, C)
    assert jnp.allclose(yb.astype(jnp.float32), yb_ref, atol=5e-2, rtol=5e-2), \
        "bf16 mismatch vs reference"

    print("KERNEL_OK")
</pallas_src>

<mosaic_0001>
module attributes {stable_mosaic.version = 11 : i64} {
  func.func @_ff_kernel(%arg0: i32, %arg1: i32, %arg2: memref<16x32xf32, #tpu.memory_space<vmem>>, %arg3: memref<1x32xf32, #tpu.memory_space<vmem>>, %arg4: memref<1x32xf32, #tpu.memory_space<vmem>>, %arg5: memref<32x64xf32, #tpu.memory_space<vmem>>, %arg6: memref<1x64xf32, #tpu.memory_space<vmem>>, %arg7: memref<64x32xf32, #tpu.memory_space<vmem>>, %arg8: memref<1x32xf32, #tpu.memory_space<vmem>>, %arg9: memref<16x32xf32, #tpu.memory_space<vmem>>, %arg10: memref<16x32xf32, #tpu.memory_space<vmem>>, %arg11: memref<16x32xf32, #tpu.memory_space<vmem>>) attributes {dimension_semantics = [#tpu.dimension_semantics<parallel>, #tpu.dimension_semantics<arbitrary>], iteration_bounds = array<i64: 1, 1>, scalar_prefetch = 0 : i64, scratch_operands = 2 : i64, tpu.core_type = #tpu.core_type<tc>, window_params = [{transform_indices = @transform_0, window_bounds = array<i64: 16, 32>}, {pipeline_mode = #tpu.pipeline_mode<synchronous>, transform_indices = @transform_1, window_bounds = array<i64: 1, 32>}, {pipeline_mode = #tpu.pipeline_mode<synchronous>, transform_indices = @transform_2, window_bounds = array<i64: 1, 32>}, {transform_indices = @transform_3, window_bounds = array<i64: 32, 64>}, {transform_indices = @transform_4, window_bounds = array<i64: 1, 64>}, {transform_indices = @transform_5, window_bounds = array<i64: 64, 32>}, {pipeline_mode = #tpu.pipeline_mode<synchronous>, transform_indices = @transform_6, window_bounds = array<i64: 1, 32>}, {transform_indices = @transform_7, window_bounds = array<i64: 16, 32>}]} {
    %c0_i32 = arith.constant 0 : i32
    %0 = arith.cmpi eq, %arg1, %c0_i32 : i32
    %1 = arith.extui %0 : i1 to i32
    %c0_i32_0 = arith.constant 0 : i32
    %2 = arith.cmpi ne, %1, %c0_i32_0 : i32
    scf.if %2 {
      %c0_18 = arith.constant 0 : index
      %c0_19 = arith.constant 0 : index
      %25 = vector.load %arg2[%c0_18, %c0_19] : memref<16x32xf32, #tpu.memory_space<vmem>>, vector<16x32xf32>
      %cst_20 = arith.constant dense<0.000000e+00> : vector<16xf32>
      %26 = vector.multi_reduction <add>, %25, %cst_20 [1] : vector<16x32xf32> to vector<16xf32>
      %27 = vector.shape_cast %26 : vector<16xf32> to vector<16x1xf32>
      %cst_21 = arith.constant 3.200000e+01 : f32
      %28 = vector.broadcast %cst_21 : f32 to vector<16x1xf32>
      %29 = arith.divf %27, %28 : vector<16x1xf32>
      %30 = vector.broadcast %29 : vector<16x1xf32> to vector<16x32xf32>
      %31 = arith.subf %25, %30 : vector<16x32xf32>
      %32 = vector.broadcast %29 : vector<16x1xf32> to vector<16x32xf32>
      %33 = arith.subf %25, %32 : vector<16x32xf32>
      %34 = arith.mulf %31, %33 : vector<16x32xf32>
      %cst_22 = arith.constant dense<0.000000e+00> : vector<16xf32>
      %35 = vector.multi_reduction <add>, %34, %cst_22 [1] : vector<16x32xf32> to vector<16xf32>
      %36 = vector.shape_cast %35 : vector<16xf32> to vector<16x1xf32>
      %cst_23 = arith.constant 3.200000e+01 : f32
      %37 = vector.broadcast %cst_23 : f32 to vector<16x1xf32>
      %38 = arith.divf %36, %37 : vector<16x1xf32>
      %39 = vector.broadcast %29 : vector<16x1xf32> to vector<16x32xf32>
      %40 = arith.subf %25, %39 : vector<16x32xf32>
      %cst_24 = arith.constant 9.99999974E-6 : f32
      %41 = vector.broadcast %cst_24 : f32 to vector<16x1xf32>
      %42 = arith.addf %38, %41 : vector<16x1xf32>
      %43 = math.rsqrt %42 : vector<16x1xf32>
      %44 = vector.broadcast %43 : vector<16x1xf32> to vector<16x32xf32>
      %45 = arith.mulf %40, %44 : vector<16x32xf32>
      %c0_25 = arith.constant 0 : index
      %c0_26 = arith.constant 0 : index
      %46 = vector.load %arg3[%c0_25, %c0_26] : memref<1x32xf32, #tpu.memory_space<vmem>>, vector<1x32xf32>
      %47 = vector.broadcast %46 : vector<1x32xf32> to vector<16x32xf32>
      %48 = arith.mulf %45, %47 : vector<16x32xf32>
      %c0_27 = arith.constant 0 : index
      %c0_28 = arith.constant 0 : index
      %49 = vector.load %arg4[%c0_27, %c0_28] : memref<1x32xf32, #tpu.memory_space<vmem>>, vector<1x32xf32>
      %50 = vector.broadcast %49 : vector<1x32xf32> to vector<16x32xf32>
      %51 = arith.addf %48, %50 : vector<16x32xf32>
      %c0_29 = arith.constant 0 : index
      %c0_30 = arith.constant 0 : index
      %52 = vector.load %arg10[%c0_29, %c0_30] : memref<16x32xf32, #tpu.memory_space<vmem>>, vector<16x32xf32>
      tpu.vector_store %arg10[%c0_29, %c0_30], %51 {strides = array<i32>} : memref<16x32xf32, #tpu.memory_space<vmem>>, vector<16x32xf32>,
      %cst_31 = arith.constant 0.000000e+00 : f32
      %53 = vector.broadcast %cst_31 : f32 to vector<16x32xf32>
      %c0_32 = arith.constant 0 : index
      %c0_33 = arith.constant 0 : index
      %54 = vector.load %arg11[%c0_32, %c0_33] : memref<16x32xf32, #tpu.memory_space<vmem>>, vector<16x32xf32>
      tpu.vector_store %arg11[%c0_32, %c0_33], %53 {strides = array<i32>} : memref<16x32xf32, #tpu.memory_space<vmem>>, vector<16x32xf32>,
    } else {
    }
    %c0 = arith.constant 0 : index
    %c0_1 = arith.constant 0 : index
    %3 = vector.load %arg10[%c0, %c0_1] : memref<16x32xf32, #tpu.memory_space<vmem>>, vector<16x32xf32>
    %c0_2 = arith.constant 0 : index
    %c0_3 = arith.constant 0 : index
    %4 = vector.load %arg5[%c0_2, %c0_3] : memref<32x64xf32, #tpu.memory_space<vmem>>, vector<32x64xf32>
    %cst = arith.constant dense<0.000000e+00> : vector<16x64xf32>
    %5 = tpu.matmul %3, %4, %cst {dimension_numbers = #tpu.dot_dimension_numbers<[1], [0], [0], [1], [0, 0, 1, 1], [], []>} : vector<16x32xf32>, vector<32x64xf32>, vector<16x64xf32> -> vector<16x64xf32>
    %c0_4 = arith.constant 0 : index
    %c0_5 = arith.constant 0 : index
    %6 = vector.load %arg6[%c0_4, %c0_5] : memref<1x64xf32, #tpu.memory_space<vmem>>, vector<1x64xf32>
    %7 = vector.broadcast %6 : vector<1x64xf32> to vector<16x64xf32>
    %8 = arith.addf %5, %7 : vector<16x64xf32>
    %cst_6 = arith.constant 5.000000e-01 : f32
    %9 = vector.broadcast %cst_6 : f32 to vector<16x64xf32>
    %10 = arith.mulf %9, %8 : vector<16x64xf32>
    %cst_7 = arith.constant 0.707106769 : f32
    %11 = vector.broadcast %cst_7 : f32 to vector<16x64xf32>
    %12 = arith.mulf %8, %11 : vector<16x64xf32>
    %13 = math.erf %12 : vector<16x64xf32>
    %cst_8 = arith.constant 1.000000e+00 : f32
    %14 = vector.broadcast %cst_8 : f32 to vector<16x64xf32>
    %15 = arith.addf %14, %13 : vector<16x64xf32>
    %16 = arith.mulf %10, %15 : vector<16x64xf32>
    %c0_9 = arith.constant 0 : index
    %c0_10 = arith.constant 0 : index
    %17 = vector.load %arg11[%c0_9, %c0_10] : memref<16x32xf32, #tpu.memory_space<vmem>>, vector<16x32xf32>
    %c0_11 = arith.constant 0 : index
    %c0_12 = arith.constant 0 : index
    %18 = vector.load %arg7[%c0_11, %c0_12] : memref<64x32xf32, #tpu.memory_space<vmem>>, vector<64x32xf32>
    %cst_13 = arith.constant dense<0.000000e+00> : vector<16x32xf32>
    %19 = tpu.matmul %16, %18, %cst_13 {dimension_numbers = #tpu.dot_dimension_numbers<[1], [0], [0], [1], [0, 0, 1, 1], [], []>} : vector<16x64xf32>, vector<64x32xf32>, vector<16x32xf32> -> vector<16x32xf32>
    %20 = arith.addf %17, %19 : vector<16x32xf32>
    %c0_14 = arith.constant 0 : index
    %c0_15 = arith.constant 0 : index
    %21 = vector.load %arg11[%c0_14, %c0_15] : memref<16x32xf32, #tpu.memory_space<vmem>>, vector<16x32xf32>
    tpu.vector_store %arg11[%c0_14, %c0_15], %20 {strides = array<i32>} : memref<16x32xf32, #tpu.memory_space<vmem>>, vector<16x32xf32>,
    %c0_i32_16 = arith.constant 0 : i32
    %22 = arith.cmpi eq, %arg1, %c0_i32_16 : i32
    %23 = arith.extui %22 : i1 to i32
    %c0_i32_17 = arith.constant 0 : i32
    %24 = arith.cmpi ne, %23, %c0_i32_17 : i32
    scf.if %24 {
      %c0_18 = arith.constant 0 : index
      %c0_19 = arith.constant 0 : index
      %25 = vector.load %arg11[%c0_18, %c0_19] : memref<16x32xf32, #tpu.memory_space<vmem>>, vector<16x32xf32>
      %c0_20 = arith.constant 0 : index
      %c0_21 = arith.constant 0 : index
      %26 = vector.load %arg8[%c0_20, %c0_21] : memref<1x32xf32, #tpu.memory_space<vmem>>, vector<1x32xf32>
      %27 = vector.broadcast %26 : vector<1x32xf32> to vector<16x32xf32>
      %28 = arith.addf %25, %27 : vector<16x32xf32>
      %c0_22 = arith.constant 0 : index
      %c0_23 = arith.constant 0 : index
      %29 = vector.load %arg9[%c0_22, %c0_23] : memref<16x32xf32, #tpu.memory_space<vmem>>, vector<16x32xf32>
      tpu.vector_store %arg9[%c0_22, %c0_23], %28 {strides = array<i32>} : memref<16x32xf32, #tpu.memory_space<vmem>>, vector<16x32xf32>,
      %c0_24 = arith.constant 0 : index
      %c0_25 = arith.constant 0 : index
      %30 = vector.load %arg9[%c0_24, %c0_25] : memref<16x32xf32, #tpu.memory_space<vmem>>, vector<16x32xf32>
      tpu.vector_store %arg9[%c0_24, %c0_25], %28 {strides = array<i32>} : memref<16x32xf32, #tpu.memory_space<vmem>>, vector<16x32xf32>,
    } else {
    }
    return
  }
  func.func @transform_0(%arg0: i32, %arg1: i32) -> (i32, i32) {
    %c0_i32 = arith.constant 0 : i32
    %c0_i32_0 = arith.constant 0 : i32
    return %arg0, %c0_i32 : i32, i32
  }
  func.func @transform_1(%arg0: i32, %arg1: i32) -> (i32, i32) {
    %c0_i32 = arith.constant 0 : i32
    %c0_i32_0 = arith.constant 0 : i32
    %c0_i32_1 = arith.constant 0 : i32
    return %c0_i32, %c0_i32_0 : i32, i32
  }
  func.func @transform_2(%arg0: i32, %arg1: i32) -> (i32, i32) {
    %c0_i32 = arith.constant 0 : i32
    %c0_i32_0 = arith.constant 0 : i32
    %c0_i32_1 = arith.constant 0 : i32
    return %c0_i32, %c0_i32_0 : i32, i32
  }
  func.func @transform_3(%arg0: i32, %arg1: i32) -> (i32, i32) {
    %c0_i32 = arith.constant 0 : i32
    %c0_i32_0 = arith.constant 0 : i32
    return %c0_i32, %arg1 : i32, i32
  }
  func.func @transform_4(%arg0: i32, %arg1: i32) -> (i32, i32) {
    %c0_i32 = arith.constant 0 : i32
    %c0_i32_0 = arith.constant 0 : i32
    return %c0_i32, %arg1 : i32, i32
  }
  func.func @transform_5(%arg0: i32, %arg1: i32) -> (i32, i32) {
    %c0_i32 = arith.constant 0 : i32
    %c0_i32_0 = arith.constant 0 : i32
    return %arg1, %c0_i32 : i32, i32
  }
  func.func @transform_6(%arg0: i32, %arg1: i32) -> (i32, i32) {
    %c0_i32 = arith.constant 0 : i32
    %c0_i32_0 = arith.constant 0 : i32
    %c0_i32_1 = arith.constant 0 : i32
    return %c0_i32, %c0_i32_0 : i32, i32
  }
  func.func @transform_7(%arg0: i32, %arg1: i32) -> (i32, i32) {
    %c0_i32 = arith.constant 0 : i32
    %c0_i32_0 = arith.constant 0 : i32
    return %arg0, %c0_i32 : i32, i32
  }
}

</mosaic_0001>

<bundles_post_ra>
// kernel: tpu_custom_call.1
= control target key start
LH: loop header
LB: loop body
LE: loop exit
PB: predicated region body
PF: predicated region fallthrough
CT: control target
= control target key end

     0   :  { %vm33_vm0 = vcmask 261120   ;;  %s523_s0 = inlined_call_operand.vmem [shape: f32[16,32], index: 0, kind: input, shape index: {}]   ;;  %s524_s1 = inlined_call_operand.vmem [shape: f32[1,32], index: 1, kind: input, shape index: {}]   ;;  %s525_s2 = inlined_call_operand.vmem [shape: f32[1,32], index: 2, kind: input, shape index: {}]   ;;  %s526_s3 = inlined_call_operand.vmem [shape: f32[32,64], index: 3, kind: input, shape index: {}]   ;;  %s527_s4 = inlined_call_operand.vmem [shape: f32[1,64], index: 4, kind: input, shape index: {}]   ;;  %s528_s5 = inlined_call_operand.vmem [shape: f32[64,32], index: 5, kind: input, shape index: {}]   ;;  %s529_s6 = inlined_call_operand.vmem [shape: f32[1,32], index: 6, kind: input, shape index: {}]   ;;  %s530_s7 = inlined_call_operand.hbm [shape: f32[16,32], index: 7, kind: output, shape index: {}]  }
   0x1   :  { %v31_v0 = vld [vmem:[%s523_s0] sm:$0xff]  ;;  %v32_v1 = vld [vmem:[%s523_s0 + $0x8] sm:$0xff] }
   0x2   :  { %12 = vsyncpa [#allocation5], 0  ;;  %v34_v2 = vsel %vm33_vm0, %v31_v0, 0.0  ;;  %v37_v3 = vsel %vm33_vm0, %v32_v1, 0.0  ;;  %v88_v14 = vld [vmem:[%s526_s3 + $0x18] sm:$0xff]  ;;  %v87_v15 = vld [vmem:[%s526_s3 + $0x10] sm:$0xff] }
   0x3   :  { %35 = vadd.xlane.f32.xlu0 %v34_v2  ;;  %342 = vmatprep.subr.mxu0 %v88_v14  ;;  %v86_v16 = vld [vmem:[%s526_s3 + $0x8] sm:$0xff]  ;;  %v85_v17 = vld [vmem:[%s526_s3] sm:$0xff]  ;;  %v197_v36 = vld [vmem:[%s528_s5 + $0x38] sm:$0xff]  ;;  %v406_v44 = vmov 0.0   ;;  %vm198_vm1 = vcmask 523264   ;;  %s407_s30 = smov [#allocation4]  }
   0x4   :  { %343 = vmatpush3.msra.mxu0 %v88_v14  ;;  %v318_v25 = vld [vmem:[%s524_s1] ss:$0 sm:$0xff]  ;;  %353 = vmatprep.subr.mxu1 %v197_v36  ;;  %v196_v37 = vld [vmem:[%s528_s5 + $0x30] sm:$0xff]  ;;  %v195_v38 = vld [vmem:[%s528_s5 + $0x28] sm:$0xff]  ;;  %82 = vst.msk [vmem:[#allocation3 + $0x8] sm:$0xff] %vm33_vm0, %v406_v44  ;;  %s307_s8 = sshll.u32 %s407_s30, 4  ;;  %s308_s8 = int_to_ptr.vmem [resolvable:$true] %s307_s8 }
   0x5   :  { %344 = vmatprep.subr.mxu0 %v87_v15  ;;  %v319_v27 = vld [vmem:[%s525_s2] ss:$0 sm:$0xff]  ;;  %354 = vmatpush3.msra.mxu1 %v197_v36  ;;  %v193_v40 = vld [vmem:[%s528_s5 + $0x18] sm:$0xff]  ;;  %v192_v41 = vld [vmem:[%s528_s5 + $0x10] sm:$0xff]  ;;  %81 = vst.msk [vmem:[#allocation3] sm:$0xff] %vm33_vm0, %v406_v44  ;;  %s384_s9 = scalar_lea.vmem %s308_s8, 256  ;;  %p389_p1 = scmp.lt.s32.totalorder %s308_s8, %s308_s8 }
   0x6   :  { %345 = vmatpush3.msra.mxu0 %v87_v15  ;;  %355 = vmatprep.subr.mxu1 %v196_v37  ;;  %v194_v39 = vld [vmem:[%s528_s5 + $0x20] sm:$0xff]  ;;  %v191_v42 = vld [vmem:[%s528_s5 + $0x8] sm:$0xff]  ;;  %p385_p0 = scmp.ne.s32.totalorder %s308_s8, %s384_s9  ;;  %p390_p2 = scmp.lt.s32.totalorder %s384_s9, %s384_s9 }
   0x7   :  { %38 = vadd.xlane.f32.xlu0 %v37_v3  ;;  %346 = vmatprep.subr.mxu0 %v86_v16  ;;  %v190_v43 = vld [vmem:[%s528_s5] sm:$0xff] }
   0x8   :  { %347 = vmatpush3.msra.mxu0 %v86_v16  ;;  %356 = vmatpush3.msra.mxu1 %v196_v37  ;;  %v320_v45 = vld [vmem:[%s527_s4] ss:$0 sm:$0xff]  ;;  %p391_p3 = por %p390_p2, %p389_p1 }
   0x9   :  { %348 = vmatprep.subr.mxu0 %v85_v17  ;;  %357 = vmatprep.subr.mxu1 %v195_v38  ;;  %v325_v2 = vld [vmem:[%s529_s6] ss:$0 sm:$0xff] }
   0xa   :  { %349 = vmatpush3.msra.mxu0 %v85_v17  ;;  %358 = vmatpush3.msra.mxu1 %v195_v38  ;;  %p392_p4 = pnand %p391_p3, %p385_p0 }
   0xb   :  { %359 = vmatprep.subr.mxu1 %v194_v39  ;;  %v189_v60 = vld [vmem:[#allocation3 + $0x8] sm:$0xff] }
   0xc   :  { %360 = vmatpush3.msra.mxu1 %v194_v39  ;;  %v188_v62 = vld [vmem:[#allocation3] sm:$0xff] }
   0xd   :  { %361 = vmatprep.subr.mxu1 %v193_v40 }
   0xe   :  { %362 = vmatpush3.msra.mxu1 %v193_v40 }
   0xf   :  { %363 = vmatprep.subr.mxu1 %v192_v41 }
  0x10   :  { %364 = vmatpush3.msra.mxu1 %v192_v41 }
  0x11   :  { %365 = vmatprep.subr.mxu1 %v191_v42 }
  0x12   :  { %366 = vmatpush3.msra.mxu1 %v191_v42 }
  0x13   :  { %367 = vmatprep.subr.mxu1 %v190_v43 }
  0x14   :  { %368 = vmatpush3.msra.mxu1 %v190_v43 }
  0x8c   :  { %v36_v4 = vpop.xlane.xlu0 %35 }
  0x8d   :  { %v41_v5 = vmul.f32 0.03125, %v36_v4 }
  0x8f   :  { %v43_v6 = vsub.f32 %v31_v0, %v41_v5 }
  0x90   :  { %v39_v7 = vpop.xlane.xlu0 %38 }
  0x91   :  { %v42_v8 = vmul.f32 0.03125, %v39_v7  ;;  %v45_v9 = vmul.f32 %v43_v6, %v43_v6 }
  0x93   :  { %v44_v10 = vsub.f32 %v32_v1, %v42_v8  ;;  %v47_v11 = vsel %vm33_vm0, %v45_v9, 0.0 }
  0x94   :  { %48 = vadd.xlane.f32.xlu1 %v47_v11 }
  0x95   :  { %v46_v12 = vmul.f32 %v44_v10, %v44_v10 }
  0x97   :  { %v50_v13 = vsel %vm33_vm0, %v46_v12, 0.0 }
  0x98   :  { %51 = vadd.xlane.f32.xlu1 %v50_v13 }
 0x11d   :  { %v49_v18 = vpop.xlane.xlu1 %48 }
 0x11e   :  { %v53_v19 = vmul.f32 0.03125, %v49_v18 }
 0x120   :  { %v55_v20 = vadd.f32 1e-05, %v53_v19 }
 0x121   :  { %v52_v21 = vpop.xlane.xlu1 %51 }
 0x122   :  { %376 = vrsqrt.f32 %v55_v20  ;;  %v54_v22 = vmul.f32 0.03125, %v52_v21 }
 0x124   :  { %v56_v23 = vadd.f32 1e-05, %v54_v22 }
 0x126   :  { %378 = vrsqrt.f32 %v56_v23 }
 0x12f   :  { %v377_v24 = vpop.eup %376 }
 0x130   :  { %v59_v26 = vmul.f32 %v377_v24, %v43_v6 }
 0x132   :  { %v68_v28 = vmul.f32 %v318_v25, %v59_v26 }
 0x133   :  { %v379_v29 = vpop.eup %378 }
 0x134   :  { %v77_v30 = vadd.f32 %v319_v27, %v68_v28  ;;  %v60_v31 = vmul.f32 %v379_v29, %v44_v10 }
 0x136   :  { %79 = vst.msk [vmem:[#allocation2] sm:$0xff] %vm33_vm0, %v77_v30  ;;  %v69_v32 = vmul.f32 %v318_v25, %v60_v31 }
 0x138   :  { %v78_v33 = vadd.f32 %v319_v27, %v69_v32 }
 0x13a   :  { %80 = vst.msk [vmem:[#allocation2 + $0x8] sm:$0xff] %vm33_vm0, %v78_v33 }
 0x13d   :  { %v83_v34 = vld [vmem:[#allocation2] sm:$0xff] }
 0x13e   :  { %350 = vmatprep.mubr.msk.f32.mxu0 %vm33_vm0, %v83_v34 }
 0x141   :  { %v84_v35 = vld [vmem:[#allocation2 + $0x8] sm:$0xff] }
 0x142   :  { %351 = vmatmul.mubr.msk.f32.vlgmr.msra.gmra.mxu0 %vm33_vm0, %v84_v35 }
 0x202   :  { %v352_v46 = vpop.f32.mrf.mxu0 }
 0x203   :  { %v175_v47 = vadd.f32 %v352_v46, %v320_v45 }
 0x204   :  { %v169_v48 = vpop.f32.mrf.mxu0 }
 0x205   :  { %v181_v49 = vmul.f32 0.70710677, %v175_v47  ;;  %v170_v50 = vadd.f32 %v320_v45, %v169_v48  ;;  %v179_v57 = vmul.f32 0.5, %v175_v47 }
 0x207   :  { %380 = verf.f32 %v181_v49  ;;  %v180_v51 = vmul.f32 0.70710677, %v170_v50  ;;  %v178_v55 = vmul.f32 0.5, %v170_v50 }
 0x209   :  { %382 = verf.f32 %v180_v51 }
 0x214   :  { %v381_v52 = vpop.eup %380 }
 0x215   :  { %v185_v54 = vadd.f32 1.0, %v381_v52 }
 0x216   :  { %v383_v53 = vpop.eup %382 }
 0x217   :  { %v184_v56 = vadd.f32 1.0, %v383_v53  ;;  %v187_v59 = vmul.f32 %v185_v54, %v179_v57 }
 0x219   :  { %v186_v58 = vmul.f32 %v184_v56, %v178_v55 }
 0x21b   :  { %369 = vmatprep.mubr.msk.f32.mxu1 %vm198_vm1, %v186_v58 }
 0x21c   :  { %370 = vmatmul.mubr.msk.f32.vlgmr.msra.gmra.mxu1 %vm198_vm1, %v187_v59 }
 0x2dc   :  { %v371_v61 = vpop.f32.mrf.mxu1 }
 0x2dd   :  { %v281_v63 = vadd.f32 %v371_v61, %v189_v60 }
 0x2de   :  { %v271_v0 = vpop.f32.mrf.mxu1 }
 0x2df   :  { %283 = vst.msk [vmem:[#allocation3 + $0x8] sm:$0xff] %vm33_vm0, %v281_v63  ;;  %v280_v1 = vadd.f32 %v271_v0, %v188_v62 }
 0x2e1   :  { %282 = vst.msk [vmem:[#allocation3] sm:$0xff] %vm33_vm0, %v280_v1 }
 0x2e6   :  { %v288_v3 = vld [vmem:[#allocation3 + $0x8] sm:$0xff] }
 0x2e7   :  { %v297_v4 = vadd.f32 %v325_v2, %v288_v3 }
 0x2e8   :  { %v287_v5 = vld [vmem:[#allocation3] sm:$0xff] }
 0x2e9   :  { %v296_v6 = vadd.f32 %v325_v2, %v287_v5  ;;  %299 = vst.msk [vmem:[#allocation4 + $0x8] sm:$0xff] %vm33_vm0, %v297_v4 }
 0x2ea   :  { %301 = vst.msk [vmem:[#allocation4 + $0x8] sm:$0xff] %vm33_vm0, %v297_v4 }
 0x2eb   :  { %298 = vst.msk [vmem:[#allocation4] sm:$0xff] %vm33_vm0, %v296_v6 }
 0x2ec   :  { %300 = vst.msk [vmem:[#allocation4] sm:$0xff] %vm33_vm0, %v296_v6 }
 0x2ed   :  { %395 = shalt.err (!%p392_p4)
}
 0x2ee   :  { %s408_s6 = smov 128   ;;  %s409_s10 = smov 8  }
 0x2ef   :  { %313 = dma.vmem_to_hbm [thread:$0]  %s308_s8, 256, %s530_s7, [#allocation5], %s408_s6, %s408_s6, %s409_s10  }
 0x2f0   :  { %404 = dma.done.wait [#allocation5], 256  }
 0x2f1   :  { %405 = vsyncadd [#allocation5], 4294967040 }
 0x2f2   :  { %317 = vsyncpa [#allocation5], 1 }

</bundles_post_ra>
